<compile_context>
chip_gen: v5e
topology: v5e:2x2
jax: 0.10.0
libtpu: 0.0.40
codegen_flags: <defaults>
</compile_context>

<pallas_src>
import functools

import jax
import jax.numpy as jnp
from jax.experimental import pallas as pl
from jax.experimental.pallas import tpu as pltpu


def _round_up(x, m):
    return ((x + m - 1) // m) * m


def choose_tk(feature_dim, target=2048):
    """K tile: the whole (128-aligned) feature dim if small, else `target`."""
    if feature_dim <= target:
        return _round_up(feature_dim, 128)
    return target


# -----------------------------------------------------------------------------
# Fused kernel: layer-1 is K-streamed and accumulated in a f32 VMEM scratch;
# bias/ReLU/layer-2/layer-3/sigmoid run once per batch tile at the last K step.
# -----------------------------------------------------------------------------
def _fused_mlp_kernel(x_ref, w1_ref, b1_ref, w2_ref, b2_ref, w3_ref, b3_ref,
                      out_ref, acc_ref):
    k = pl.program_id(1)

    @pl.when(k == 0)
    def _init():
        acc_ref[...] = jnp.zeros_like(acc_ref)

    # layer1 partial product: (tm, tk) @ (tk, H), bf16 inputs, f32 accumulate.
    acc_ref[...] += jnp.dot(x_ref[...], w1_ref[...],
                            preferred_element_type=jnp.float32)

    @pl.when(k == pl.num_programs(1) - 1)
    def _finish():
        # layer1 bias + ReLU (dropout is identity at inference).
        h1 = jnp.maximum(acc_ref[...] + b1_ref[...], 0.0)            # (tm, H)
        # layer2 + ReLU.
        a2 = jnp.dot(h1.astype(jnp.bfloat16), w2_ref[...],
                     preferred_element_type=jnp.float32)
        a2 = jnp.maximum(a2 + b2_ref[...], 0.0)                      # (tm, H2)
        # layer3 (H2 -> 1): contract against the single w3 row so the logit
        # lands directly lane-dense as (1, tm) (no N=1 MXU output / masked
        # lane-width-1 stores).
        logit = jnp.einsum("oh,mh->om", w3_ref[...], a2,
                           preferred_element_type=jnp.float32)       # (1, tm)
        out_ref[...] = jax.nn.sigmoid(logit + b3_ref[0])


# -----------------------------------------------------------------------------
# K-split kernel (v7x small-batch): each split produces the partial pre-bias
# layer-1 accumulation over its slice of the K range.  The leading grid axis is
# "parallel" so the halves land on the two TensorCores of a v7x chip (each TC
# has its own HBM port); a tiny JAX epilogue finishes the MLP.
# -----------------------------------------------------------------------------
def _layer1_partial_kernel(x_ref, w1_ref, out_ref, acc_ref):
    k = pl.program_id(1)

    @pl.when(k == 0)
    def _init():
        acc_ref[...] = jnp.zeros_like(acc_ref)

    acc_ref[...] += jnp.dot(x_ref[...], w1_ref[...],
                            preferred_element_type=jnp.float32)

    @pl.when(k == pl.num_programs(1) - 1)
    def _finish():
        out_ref[...] = acc_ref[...]


# -----------------------------------------------------------------------------
# Tile selection: stay under the v5e 16 MiB default scoped VMEM unless the
# caller raises vmem_limit_bytes.
# -----------------------------------------------------------------------------
_DEFAULT_VMEM_BUDGET = 14 * 1024 * 1024


def _vmem_footprint(tm, tk, H, H2):
    return (2 * tm * tk * 2          # double-buffered bf16 x tile
            + 2 * tk * H * 2         # double-buffered bf16 w1 block
            + tm * H * 4             # f32 layer-1 accumulator
            + 2 * tm * H * 4         # worst case: (tm, H) f32 out blocks (split path)
            + H * H2 * 2             # resident bf16 w2
            + (H + 2 * H2 + 1) * 4)  # biases + w3 row


def _choose_tm(B, tk, H, H2, budget):
    # Whole batch in one tile whenever it fits -> w1 is streamed exactly once.
    tm_full = max(16, _round_up(B, 16))       # 16: bf16 sublane packing
    if _vmem_footprint(tm_full, tk, H, H2) <= budget:
        return tm_full, 1
    # Otherwise tile the batch with a 128-multiple tm (lane-dense out blocks).
    tm = 1024
    while tm > 128 and _vmem_footprint(tm, tk, H, H2) > budget:
        tm //= 2
    return tm, pl.cdiv(B, tm)


@functools.partial(jax.jit,
                   static_argnames=("tk", "num_k_splits", "vmem_limit_bytes"))
def binary_classifier_forward(x, w1, b1, w2, b2, w3, b3, *,
                              tk=2048, num_k_splits=1, vmem_limit_bytes=None):
    """x: (B, F) f32 -> (B,) f32 probabilities (matches .squeeze()).

    w1: (F_pad, H) bf16, pre-padded along F to a multiple of tk (init_params),
    w2: (H, H2) bf16 (both are transposes of PyTorch Linear.weight),
    b1: (1, H) f32, b2: (1, H2) f32, w3: (1, H2) f32 row, b3: (1,) f32 scalar.
    """
    B, F = x.shape
    F_pad, H = w1.shape
    H2 = w2.shape[1]

    tk = min(tk, F_pad)
    if F_pad % tk != 0:
        raise ValueError(
            f"w1 feature dim {F_pad} must be a multiple of tk={tk}; "
            "pre-pad w1 via init_params(..., tk=tk).")
    n_kt = F_pad // tk

    budget = int(0.9 * vmem_limit_bytes) if vmem_limit_bytes else _DEFAULT_VMEM_BUDGET
    tm, n_bt = _choose_tm(B, tk, H, H2, budget)
    B_pad = n_bt * tm

    # bf16 cast + zero padding (exact for the matmul) happen only on the small
    # x, never on the ~142 MB w1 (that pad is hoisted to param-prep time).
    x_p = jnp.pad(x.astype(jnp.bfloat16), ((0, B_pad - B), (0, F_pad - F)))

    compiler_params = pltpu.CompilerParams(
        dimension_semantics=("parallel", "arbitrary"),
        vmem_limit_bytes=vmem_limit_bytes,
    )

    bytes_w1 = F_pad * H * 2
    bytes_x = B_pad * F_pad * 2
    bytes_small = H * H2 * 2 + (H + 2 * H2 + 1) * 4

    use_split = (num_k_splits > 1 and n_bt == 1 and n_kt % num_k_splits == 0)

    if use_split:
        # v7x small-batch path: split the K reduction across TensorCores.
        n_kt_local = n_kt // num_k_splits
        cost = pl.CostEstimate(
            flops=2 * B_pad * F_pad * H,
            transcendentals=0,
            bytes_accessed=bytes_x + bytes_w1 + num_k_splits * tm * H * 4,
        )
        partial = pl.pallas_call(
            _layer1_partial_kernel,
            out_shape=jax.ShapeDtypeStruct((num_k_splits * tm, H), jnp.float32),
            grid_spec=pltpu.PrefetchScalarGridSpec(
                num_scalar_prefetch=0,
                grid=(num_k_splits, n_kt_local),     # split axis parallel, K last
                in_specs=[
                    pl.BlockSpec((tm, tk), lambda s, k: (0, s * n_kt_local + k)),
                    pl.BlockSpec((tk, H), lambda s, k: (s * n_kt_local + k, 0)),
                ],
                out_specs=pl.BlockSpec((tm, H), lambda s, k: (s, 0)),
                scratch_shapes=[pltpu.VMEM((tm, H), jnp.float32)],
            ),
            compiler_params=compiler_params,
            cost_estimate=cost,
        )(x_p, w1)
        # Tiny epilogue (H=256, H2=128 at the real sizes) in plain JAX.
        h1_pre = jnp.sum(partial.reshape(num_k_splits, tm, H), axis=0)
        h1 = jnp.maximum(h1_pre + b1, 0.0)
        a2 = jnp.dot(h1.astype(jnp.bfloat16), w2,
                     preferred_element_type=jnp.float32)
        a2 = jnp.maximum(a2 + b2, 0.0)
        logit = jnp.sum(a2 * w3, axis=-1) + b3[0]
        return jax.nn.sigmoid(logit)[:B]

    # Default fused path (all chips): everything inside one kernel.
    cost = pl.CostEstimate(
        flops=2 * B_pad * (F_pad * H + H * H2 + H2),
        transcendentals=B_pad,
        bytes_accessed=bytes_x + n_bt * bytes_w1 + bytes_small + B_pad * 4,
    )
    grid_spec = pltpu.PrefetchScalarGridSpec(
        num_scalar_prefetch=0,
        grid=(n_bt, n_kt),                           # reduction (K) axis last
        in_specs=[
            pl.BlockSpec((tm, tk), lambda i, k: (i, k)),    # x tile (bf16)
            pl.BlockSpec((tk, H), lambda i, k: (k, 0)),     # w1 streamed blocks
            pl.BlockSpec((1, H), lambda i, k: (0, 0)),      # b1 (resident)
            pl.BlockSpec((H, H2), lambda i, k: (0, 0)),     # w2 (resident)
            pl.BlockSpec((1, H2), lambda i, k: (0, 0)),     # b2 (resident)
            pl.BlockSpec((1, H2), lambda i, k: (0, 0)),     # w3 row (resident)
            pl.BlockSpec(memory_space=pltpu.MemorySpace.SMEM),   # b3 scalar
        ],
        out_specs=pl.BlockSpec((1, tm), lambda i, k: (0, i)),    # lane-dense slab
        scratch_shapes=[pltpu.VMEM((tm, H), jnp.float32)],       # layer1 acc
    )
    out = pl.pallas_call(
        _fused_mlp_kernel,
        out_shape=jax.ShapeDtypeStruct((1, B_pad), jnp.float32),
        grid_spec=grid_spec,
        compiler_params=compiler_params,
        cost_estimate=cost,
    )(x_p, w1, b1, w2, b2, w3, b3)
    return out[0, :B]


def init_params(key, feature_dim, hidden_dim, *, tk=2048):
    """PyTorch-style uniform(+/- 1/sqrt(fan_in)) init.

    w1/w2 are stored in bfloat16; w1 is pre-padded along the feature dim to a
    multiple of tk (zero rows => exact) so the jitted forward never copies it.
    """
    hdim2 = hidden_dim // 2

    def linear(key, fan_in, fan_out, w_dtype):
        kw, kb = jax.random.split(key)
        bound = 1.0 / jnp.sqrt(float(fan_in))
        w = jax.random.uniform(kw, (fan_in, fan_out), jnp.float32,
                               -bound, bound).astype(w_dtype)
        b = jax.random.uniform(kb, (1, fan_out), jnp.float32, -bound, bound)
        return w, b

    k1, k2, k3 = jax.random.split(key, 3)
    w1, b1 = linear(k1, feature_dim, hidden_dim, jnp.bfloat16)
    w2, b2 = linear(k2, hidden_dim, hdim2, jnp.bfloat16)
    w3, b3 = linear(k3, hdim2, 1, jnp.float32)

    tk = min(tk, _round_up(feature_dim, 128))
    f_pad = _round_up(feature_dim, tk)
    w1 = jnp.pad(w1, ((0, f_pad - feature_dim), (0, 0)))    # one-time, out of jit

    w3_row = w3.reshape(1, hdim2)   # (1, H2) row for the in-kernel contraction
    b3_s = b3.reshape(1)            # (1,) scalar for SMEM
    return w1, b1, w2, b2, w3_row, b3_s


if __name__ == "__main__":
    # Small shapes consistent with the module (real default is
    # feature_dim = 708*14*14 = 138768, hidden_dim = 256).  Scaled down but with
    # several K blocks so the streaming / accumulation / K-split paths are
    # exercised (real-size tk default is 2048, see choose_tk).
    B = 8
    FEATURE_DIM = 1024
    HIDDEN_DIM = 32
    TK = 256

    key = jax.random.PRNGKey(0)
    kx, kp = jax.random.split(key)

    x = jax.random.normal(kx, (B, FEATURE_DIM), dtype=jnp.float32)
    params = init_params(kp, FEATURE_DIM, HIDDEN_DIM, tk=TK)
    w1_p, b1, w2, b2, w3, b3 = params

    # Pure-JAX reference with the same bf16-weight / f32-accumulate math.
    F_pad = w1_p.shape[0]
    x_bf = jnp.pad(x.astype(jnp.bfloat16), ((0, 0), (0, F_pad - FEATURE_DIM)))
    h1 = jnp.maximum(
        jnp.dot(x_bf, w1_p, preferred_element_type=jnp.float32) + b1, 0.0)
    a2 = jnp.maximum(
        jnp.dot(h1.astype(jnp.bfloat16), w2,
                preferred_element_type=jnp.float32) + b2, 0.0)
    ref = jax.nn.sigmoid(jnp.sum(a2 * w3, axis=-1) + b3[0])

    # 1) fused single-kernel path (default on all chips).
    y = binary_classifier_forward(x, *params, tk=TK)
    y = jax.block_until_ready(y)
    assert y.shape == (B,), y.shape
    assert jnp.allclose(y, ref, atol=2e-3, rtol=2e-3), (y, ref)

    # 2) v7x small-batch path: K reduction split across the two TensorCores
    #    (also valid, just not faster, on single-TC v5e/v6e).
    y2 = binary_classifier_forward(x, *params, tk=TK, num_k_splits=2)
    y2 = jax.block_until_ready(y2)
    assert y2.shape == (B,), y2.shape
    assert jnp.allclose(y2, ref, atol=2e-3, rtol=2e-3), (y2, ref)

    print("KERNEL_OK")
</pallas_src>

<mosaic_0001>
module attributes {stable_mosaic.version = 11 : i64} {
  func.func @_fused_mlp_kernel(%arg0: i32, %arg1: i32, %arg2: memref<16x256xbf16, #tpu.memory_space<vmem>>, %arg3: memref<256x32xbf16, #tpu.memory_space<vmem>>, %arg4: memref<1x32xf32, #tpu.memory_space<vmem>>, %arg5: memref<32x16xbf16, #tpu.memory_space<vmem>>, %arg6: memref<1x16xf32, #tpu.memory_space<vmem>>, %arg7: memref<1x16xf32, #tpu.memory_space<vmem>>, %arg8: memref<1xf32, #tpu.memory_space<smem>>, %arg9: memref<1x16xf32, #tpu.memory_space<vmem>>, %arg10: memref<16x32xf32, #tpu.memory_space<vmem>>) attributes {dimension_semantics = [#tpu.dimension_semantics<parallel>, #tpu.dimension_semantics<arbitrary>], iteration_bounds = array<i64: 1, 4>, scalar_prefetch = 0 : i64, scratch_operands = 1 : i64, tpu.core_type = #tpu.core_type<tc>, window_params = [{transform_indices = @transform_0, window_bounds = array<i64: 16, 256>}, {transform_indices = @transform_1, window_bounds = array<i64: 256, 32>}, {pipeline_mode = #tpu.pipeline_mode<synchronous>, transform_indices = @transform_2, window_bounds = array<i64: 1, 32>}, {pipeline_mode = #tpu.pipeline_mode<synchronous>, transform_indices = @transform_3, window_bounds = array<i64: 32, 16>}, {pipeline_mode = #tpu.pipeline_mode<synchronous>, transform_indices = @transform_4, window_bounds = array<i64: 1, 16>}, {pipeline_mode = #tpu.pipeline_mode<synchronous>, transform_indices = @transform_5, window_bounds = array<i64: 1, 16>}, {transform_indices = @transform_6, window_bounds = array<i64: 1>}, {transform_indices = @transform_7, window_bounds = array<i64: 1, 16>}]} {
    %c0_i32 = arith.constant 0 : i32
    %0 = arith.cmpi eq, %arg1, %c0_i32 : i32
    %1 = arith.extui %0 : i1 to i32
    %c0_i32_0 = arith.constant 0 : i32
    %2 = arith.cmpi ne, %1, %c0_i32_0 : i32
    scf.if %2 {
      %cst_9 = arith.constant 0.000000e+00 : f32
      %12 = vector.broadcast %cst_9 : f32 to vector<16x32xf32>
      %c0_10 = arith.constant 0 : index
      %c0_11 = arith.constant 0 : index
      %13 = vector.load %arg10[%c0_10, %c0_11] : memref<16x32xf32, #tpu.memory_space<vmem>>, vector<16x32xf32>
      tpu.vector_store %arg10[%c0_10, %c0_11], %12 {strides = array<i32>} : memref<16x32xf32, #tpu.memory_space<vmem>>, vector<16x32xf32>,
    } else {
    }
    %c0 = arith.constant 0 : index
    %c0_1 = arith.constant 0 : index
    %3 = vector.load %arg10[%c0, %c0_1] : memref<16x32xf32, #tpu.memory_space<vmem>>, vector<16x32xf32>
    %c0_2 = arith.constant 0 : index
    %c0_3 = arith.constant 0 : index
    %4 = vector.load %arg2[%c0_2, %c0_3] : memref<16x256xbf16, #tpu.memory_space<vmem>>, vector<16x256xbf16>
    %c0_4 = arith.constant 0 : index
    %c0_5 = arith.constant 0 : index
    %5 = vector.load %arg3[%c0_4, %c0_5] : memref<256x32xbf16, #tpu.memory_space<vmem>>, vector<256x32xbf16>
    %cst = arith.constant dense<0.000000e+00> : vector<16x32xf32>
    %6 = tpu.matmul %4, %5, %cst {dimension_numbers = #tpu.dot_dimension_numbers<[1], [0], [0], [1], [0, 0, 1, 1], [], []>} : vector<16x256xbf16>, vector<256x32xbf16>, vector<16x32xf32> -> vector<16x32xf32>
    %7 = arith.addf %3, %6 : vector<16x32xf32>
    %c0_6 = arith.constant 0 : index
    %c0_7 = arith.constant 0 : index
    %8 = vector.load %arg10[%c0_6, %c0_7] : memref<16x32xf32, #tpu.memory_space<vmem>>, vector<16x32xf32>
    tpu.vector_store %arg10[%c0_6, %c0_7], %7 {strides = array<i32>} : memref<16x32xf32, #tpu.memory_space<vmem>>, vector<16x32xf32>,
    %c3_i32 = arith.constant 3 : i32
    %9 = arith.cmpi eq, %arg1, %c3_i32 : i32
    %10 = arith.extui %9 : i1 to i32
    %c0_i32_8 = arith.constant 0 : i32
    %11 = arith.cmpi ne, %10, %c0_i32_8 : i32
    scf.if %11 {
      %c0_9 = arith.constant 0 : index
      %c0_10 = arith.constant 0 : index
      %12 = vector.load %arg10[%c0_9, %c0_10] : memref<16x32xf32, #tpu.memory_space<vmem>>, vector<16x32xf32>
      %c0_11 = arith.constant 0 : index
      %c0_12 = arith.constant 0 : index
      %13 = vector.load %arg4[%c0_11, %c0_12] : memref<1x32xf32, #tpu.memory_space<vmem>>, vector<1x32xf32>
      %14 = vector.broadcast %13 : vector<1x32xf32> to vector<16x32xf32>
      %15 = arith.addf %12, %14 : vector<16x32xf32>
      %cst_13 = arith.constant 0.000000e+00 : f32
      %16 = vector.broadcast %cst_13 : f32 to vector<16x32xf32>
      %17 = arith.maximumf %15, %16 : vector<16x32xf32>
      %18 = arith.truncf %17 : vector<16x32xf32> to vector<16x32xbf16>
      %c0_14 = arith.constant 0 : index
      %c0_15 = arith.constant 0 : index
      %19 = vector.load %arg5[%c0_14, %c0_15] : memref<32x16xbf16, #tpu.memory_space<vmem>>, vector<32x16xbf16>
      %cst_16 = arith.constant dense<0.000000e+00> : vector<16x16xf32>
      %20 = tpu.matmul %18, %19, %cst_16 {dimension_numbers = #tpu.dot_dimension_numbers<[1], [0], [0], [1], [0, 0, 1, 1], [], []>} : vector<16x32xbf16>, vector<32x16xbf16>, vector<16x16xf32> -> vector<16x16xf32>
      %c0_17 = arith.constant 0 : index
      %c0_18 = arith.constant 0 : index
      %21 = vector.load %arg6[%c0_17, %c0_18] : memref<1x16xf32, #tpu.memory_space<vmem>>, vector<1x16xf32>
      %22 = vector.broadcast %21 : vector<1x16xf32> to vector<16x16xf32>
      %23 = arith.addf %20, %22 : vector<16x16xf32>
      %cst_19 = arith.constant 0.000000e+00 : f32
      %24 = vector.broadcast %cst_19 : f32 to vector<16x16xf32>
      %25 = arith.maximumf %23, %24 : vector<16x16xf32>
      %c0_20 = arith.constant 0 : index
      %c0_21 = arith.constant 0 : index
      %26 = vector.load %arg7[%c0_20, %c0_21] : memref<1x16xf32, #tpu.memory_space<vmem>>, vector<1x16xf32>
      "tpu.trace_start"() <{level = 10 : i32, message = "oh,mh->om"}> : () -> ()
      %cst_22 = arith.constant dense<0.000000e+00> : vector<1x16xf32>
      %27 = tpu.matmul %26, %25, %cst_22 {dimension_numbers = #tpu.dot_dimension_numbers<[1], [1], [0], [0], [0, 0, 1, 0], [], []>} : vector<1x16xf32>, vector<16x16xf32>, vector<1x16xf32> -> vector<1x16xf32>
      "tpu.trace_stop"() : () -> ()
      %c0_23 = arith.constant 0 : index
      %28 = memref.load %arg8[%c0_23] : memref<1xf32, #tpu.memory_space<smem>>
      %29 = vector.broadcast %28 : f32 to vector<1x16xf32>
      %30 = arith.addf %27, %29 : vector<1x16xf32>
      %31 = arith.negf %30 : vector<1x16xf32>
      %32 = math.exp %31 : vector<1x16xf32>
      %cst_24 = arith.constant 1.000000e+00 : f32
      %33 = vector.broadcast %cst_24 : f32 to vector<1x16xf32>
      %34 = arith.addf %33, %32 : vector<1x16xf32>
      %35 = arith.divf %33, %34 : vector<1x16xf32>
      %c0_25 = arith.constant 0 : index
      %c0_26 = arith.constant 0 : index
      %36 = vector.load %arg9[%c0_25, %c0_26] : memref<1x16xf32, #tpu.memory_space<vmem>>, vector<1x16xf32>
      tpu.vector_store %arg9[%c0_25, %c0_26], %35 {strides = array<i32>} : memref<1x16xf32, #tpu.memory_space<vmem>>, vector<1x16xf32>,
    } else {
    }
    return
  }
  func.func @transform_0(%arg0: i32, %arg1: i32) -> (i32, i32) {
    %c0_i32 = arith.constant 0 : i32
    return %arg0, %arg1 : i32, i32
  }
  func.func @transform_1(%arg0: i32, %arg1: i32) -> (i32, i32) {
    %c0_i32 = arith.constant 0 : i32
    %c0_i32_0 = arith.constant 0 : i32
    return %arg1, %c0_i32 : i32, i32
  }
  func.func @transform_2(%arg0: i32, %arg1: i32) -> (i32, i32) {
    %c0_i32 = arith.constant 0 : i32
    %c0_i32_0 = arith.constant 0 : i32
    %c0_i32_1 = arith.constant 0 : i32
    return %c0_i32, %c0_i32_0 : i32, i32
  }
  func.func @transform_3(%arg0: i32, %arg1: i32) -> (i32, i32) {
    %c0_i32 = arith.constant 0 : i32
    %c0_i32_0 = arith.constant 0 : i32
    %c0_i32_1 = arith.constant 0 : i32
    return %c0_i32, %c0_i32_0 : i32, i32
  }
  func.func @transform_4(%arg0: i32, %arg1: i32) -> (i32, i32) {
    %c0_i32 = arith.constant 0 : i32
    %c0_i32_0 = arith.constant 0 : i32
    %c0_i32_1 = arith.constant 0 : i32
    return %c0_i32, %c0_i32_0 : i32, i32
  }
  func.func @transform_5(%arg0: i32, %arg1: i32) -> (i32, i32) {
    %c0_i32 = arith.constant 0 : i32
    %c0_i32_0 = arith.constant 0 : i32
    %c0_i32_1 = arith.constant 0 : i32
    return %c0_i32, %c0_i32_0 : i32, i32
  }
  func.func @transform_6(%arg0: i32, %arg1: i32) -> i32 {
    %c0_i32 = arith.constant 0 : i32
    %c0_i32_0 = arith.constant 0 : i32
    return %c0_i32 : i32
  }
  func.func @transform_7(%arg0: i32, %arg1: i32) -> (i32, i32) {
    %c0_i32 = arith.constant 0 : i32
    %c0_i32_0 = arith.constant 0 : i32
    return %c0_i32, %arg0 : i32, i32
  }
}

</mosaic_0001>

<bundles_post_ra>
// kernel: binary_classifier_forward.1
= control target key start
LH: loop header
LB: loop body
LE: loop exit
PB: predicated region body
PF: predicated region fallthrough
CT: control target
= control target key end

     0   :  { %s1086_s0 = inlined_call_operand.vmem [shape: bf16[16,1024], index: 0, kind: input, shape index: {}]   ;;  %s1087_s1 = inlined_call_operand.vmem [shape: bf16[1024,32], index: 1, kind: input, shape index: {}]   ;;  %s1088_s2 = inlined_call_operand.vmem [shape: f32[1,32], index: 2, kind: input, shape index: {}]   ;;  %s1089_s3 = inlined_call_operand.vmem [shape: bf16[32,16], index: 3, kind: input, shape index: {}]   ;;  %s1090_s4 = inlined_call_operand.vmem [shape: f32[1,16], index: 4, kind: input, shape index: {}]   ;;  %s1091_s5 = inlined_call_operand.vmem [shape: f32[1,16], index: 5, kind: input, shape index: {}]   ;;  %s1092_s6 = inlined_call_operand.<no memory space> [shape: f32[1], index: 6, kind: input, shape index: {}]   ;;  %s1093_s7 = inlined_call_operand.vmem [shape: f32[1,16], index: 7, kind: output, shape index: {}]  }
   0x1   :  { %12 = sst [smem:[#allocation3]] %s1092_s6 }
   0x2   :  { %s974_s26 = smov 0   ;;  %s976_s27 = smov 0  }
   0x3   :  { %s978_s28 = smov 0   ;;  %s980_s29 = smov 0  }
   0x4   :  { %s982_s30 = smov 0  }
   0x5 LB: > { %s27_s6 = sadd.s32 1, %s924_s29  ;;  %p46_p1 = scmp.ne.s32.totalorder %s916_s27, %s912_s26  ;;  %s928_s30 = sphi %s982_s30, %s18_s30   ;;  %s924_s29 = sphi %s980_s29, %s1097_s29   ;;  %s920_s28 = sphi %s978_s28, %s1096_s28   ;;  %s916_s27 = sphi %s976_s27, %s1095_s27   ;;  %s912_s26 = sphi %s974_s26, %s1094_s26  }
   0x6   : > { %p28_p0 = scmp.ge.s32.totalorder %s27_s6, 4  ;;  %p47_p2 = scmp.eq.s32.totalorder %s928_s30, 0 }
   0x7   : > { %s39_s9 = sadd.s32 1, %s916_s27  ;;  %p724_p5 = scmp.ge.s32.totalorder %s928_s30, 4 }
   0x8   : > { %s1099_s6 = smov (%p28_p0, %s27_s6), 0  ;;  %p48_p3 = por %p47_p2, %p46_p1 }
   0x9   : > { %s35_s8 = ssub.s32 %s924_s29, %s1099_s6  ;;  %244 = sbr.rel (%p724_p5) target bundleno = 20 (0x14), region = 36 }
   0xa   : > { %p37_p4 = scmp.eq.s32.totalorder %s35_s8, 0 }
   0xc   : > { %s1009_s10 = scalar_select %p37_p4, %s916_s27, %s39_s9  }
   0xe   : > { %247 = sbr.rel (!%p48_p3) target bundleno = 20 (0x14), region = 40  ;;  %s249_s11 = sand.u32 (%p48_p3), 1, %s916_s27  }
   0xf   : > { %s822_s12 = sshll.u32 (%p48_p3), %s924_s29, 3  ;;  %s725_s13 = sshll.u32 (%p48_p3), %s249_s11, 4 }
  0x10   : > { %s257_s16 = scalar_lea.vmem (%p48_p3), %s1086_s0, %s822_s12  ;;  %s251_s17 = scalar_lea.vmem (%p48_p3), [#allocation4], %s725_s13 }
  0x11   : > { %v288_v0 = vld [vmem:[%s257_s16] sm:$0xff] (%p48_p3) }
  0x12   : > { %v290_v1 = vld [vmem:[%s257_s16 + $0x20] sm:$0xff] (%p48_p3)  ;;  %289 = vst [vmem:[%s251_s17] sm:$0xff] (%p48_p3), %v288_v0 }
  0x13   : > { %291 = vst [vmem:[%s251_s17 + $0x8] sm:$0xff] %v290_v1 }
  0x14 PF: > { %p728_p6 = scmp.ge.s32.totalorder %s928_s30, 1  ;;  %p305_p7 = scmp.lt.s32.totalorder %s928_s30, 5 }
  0x16   : > { %p306_p8 = pnand %p728_p6, %p305_p7 }
  0x17   : > { %s312_s18 = sand.u32 (!%p306_p8), 1, %s912_s26   ;;  %s730_s19 = sshll.u32 (!%p306_p8), %s920_s28, 5 }
  0x18   : > { %309 = sbr.rel (%p306_p8) target bundleno = 524 (0x20c), region = 82  ;;  %s729_s20 = sshll.u32 (!%p306_p8), %s312_s18, 4 }
  0x19   : > { %p349_p9 = scmp.lt.s32.totalorder (!%p306_p8), %s730_s19, 127  ;;  %s1026_s25 = scalar_lea.vmem (!%p306_p8), [#allocation4], %s729_s20 }
  0x1a   : > { %p732_p10 = scmp.ne.s32.totalorder (!%p306_p8), %s920_s28, 0 }
  0x1d   : > { %s1101_s19 = smov (!%p349_p9, %s730_s19), 127  ;;  %361 = sbr.rel (%p732_p10) target bundleno = 37 (0x25), region = 90 }
  0x1e   : > { %s731_s21 = sshll.u32 %s1101_s19, 2 }
  0x1f   : > { %s1024_s24 = scalar_lea.vmem %s1087_s1, %s731_s21 }
  0x22   : > { %vm362_vm0 = vcmask 261120   ;;  %v930_v2 = vmov 0.0  }
  0x23   : > { %363 = vst.msk [vmem:[#allocation2] sm:$0xff] %vm362_vm0, %v930_v2 }
  0x24   : > { %364 = vst.msk [vmem:[#allocation2 + $0x8] sm:$0xff] %vm362_vm0, %v930_v2 }
  0x25 PF: > { %v832_v3 = vld [vmem:[%s1024_s24 + $0x38] sm:$0xff]  ;;  %v831_v5 = vld [vmem:[%s1024_s24 + $0x30] sm:$0xff]  ;;  %v830_v7 = vld [vmem:[%s1024_s24 + $0x28] sm:$0xff]  ;;  %vm537_vm1 = vcmask 261120   ;;  %p805_p11 = scmp.ne.s32.totalorder %s920_s28, 3 }
  0x26   : > { %v840_v4 = vld [vmem:[%s1024_s24 + $0x78] sm:$0xff]  ;;  %507 = vmatpush.bf16.msra.mxu0 %v832_v3  ;;  %v839_v6 = vld [vmem:[%s1024_s24 + $0x70] sm:$0xff]  ;;  %v838_v8 = vld [vmem:[%s1024_s24 + $0x68] sm:$0xff]  ;;  %s595_s17 = sld [smem:[#allocation3]] (!%p805_p11) }
  0x27   : > { %521 = vmatpush.bf16.msra.mxu1 %v840_v4  ;;  %v829_v9 = vld [vmem:[%s1024_s24 + $0x20] sm:$0xff]  ;;  %v828_v11 = vld [vmem:[%s1024_s24 + $0x18] sm:$0xff]  ;;  %v827_v13 = vld [vmem:[%s1024_s24 + $0x10] sm:$0xff] }
  0x28   : > { %v837_v10 = vld [vmem:[%s1024_s24 + $0x60] sm:$0xff]  ;;  %v836_v12 = vld [vmem:[%s1024_s24 + $0x58] sm:$0xff]  ;;  %v835_v14 = vld [vmem:[%s1024_s24 + $0x50] sm:$0xff] }
  0x29   : > { %v826_v15 = vld [vmem:[%s1024_s24 + $0x8] sm:$0xff]  ;;  %v825_v17 = vld [vmem:[%s1024_s24] sm:$0xff] }
  0x2a   : > { %508 = vmatpush.bf16.msra.mxu0 %v831_v5  ;;  %v834_v16 = vld [vmem:[%s1024_s24 + $0x48] sm:$0xff]  ;;  %v833_v18 = vld [vmem:[%s1024_s24 + $0x40] sm:$0xff] }
  0x2b   : > { %522 = vmatpush.bf16.msra.mxu1 %v839_v6  ;;  %v735_v19 = vld [vmem:[%s1026_s25] sm:$0xf]  ;;  %v824_v20 = vld [vmem:[%s1026_s25 + $0x4] sm:$0xf0]  ;;  %v823_v21 = vld [vmem:[%s1026_s25 + $0x4] sm:$0xf] }
  0x2c   : > { %v737_v22 = vld [vmem:[%s1026_s25 + $0x8] sm:$0xf0]  ;;  %v736_v23 = vor.u32 %v824_v20, %v735_v19  ;;  %v365_v26 = vld [vmem:[#allocation2] sm:$0xff] }
  0x2d   : > { %v740_v24 = vor.u32 %v823_v21, %v737_v22  ;;  %v366_v31 = vld [vmem:[#allocation2 + $0x8] sm:$0xff] }
  0x2e   : > { %509 = vmatpush.bf16.msra.mxu0 %v830_v7 }
  0x2f   : > { %523 = vmatpush.bf16.msra.mxu1 %v838_v8 }
  0x32   : > { %510 = vmatpush.bf16.msra.mxu0 %v829_v9 }
  0x33   : > { %524 = vmatpush.bf16.msra.mxu1 %v837_v10 }
  0x36   : > { %511 = vmatpush.bf16.msra.mxu0 %v828_v11 }
  0x37   : > { %525 = vmatpush.bf16.msra.mxu1 %v836_v12 }
  0x3a   : > { %512 = vmatpush.bf16.msra.mxu0 %v827_v13 }
  0x3b   : > { %526 = vmatpush.bf16.msra.mxu1 %v835_v14 }
  0x3e   : > { %513 = vmatpush.bf16.msra.mxu0 %v826_v15 }
  0x3f   : > { %527 = vmatpush.bf16.msra.mxu1 %v834_v16 }
  0x42   : > { %514 = vmatpush.bf16.msra.mxu0 %v825_v17 }
  0x43   : > { %528 = vmatpush.bf16.msra.mxu1 %v833_v18 }
  0x45   : > { %515 = vmatmul.bf16.vlgmr.msra.gmra.mxu0 %v736_v23 }
  0x46   : > { %529 = vmatmul.bf16.vlgmr.msra.gmra.mxu1 %v740_v24 }
  0xc2   : > { %v516_v25 = vpop.f32.mrf.mxu0 }
  0xc3   : > { %v530_v27 = vpop.f32.mrf.mxu1 }
  0xc4   : > { %v531_v28 = vadd.f32 %v530_v27, %v516_v25 }
  0xc6   : > { %v535_v29 = vadd.f32 %v531_v28, %v365_v26 }
  0xc8   : > { %538 = vst.msk [vmem:[#allocation2] sm:$0xff] %vm537_vm1, %v535_v29 }
  0xca   : > { %v518_v30 = vpop.f32.mrf.mxu0 }
  0xcb   : > { %v532_v32 = vpop.f32.mrf.mxu1 }
  0xcc   : > { %v533_v33 = vadd.f32 %v532_v32, %v518_v30  ;;  %543 = sbr.rel (%p805_p11) target bundleno = 524 (0x20c), region = 94 }
  0xce   : > { %v536_v34 = vadd.f32 %v533_v33, %v366_v31 }
  0xd0   : > { %539 = vst.msk [vmem:[#allocation2 + $0x8] sm:$0xff] %vm537_vm1, %v536_v34 }
  0xd1   : > { %v842_v35 = vld [vmem:[%s1089_s3 + $0x8] sm:$0xff]  ;;  %v544_v36 = vld [vmem:[#allocation2] sm:$0xff]  ;;  %vm597_vm2 = vcmask 130048   ;;  %v596_v53 = vstv %s595_s17  ;;  %vm646_vm6 = vcmask 122880  }
  0xd2   : > { %v884_v38 = vld [vmem:[%s1088_s2] ss:$0 sm:$0xff]  ;;  %584 = vmatpush.bf16.msra.mxu0 %v842_v35 }
  0xd3   : > { %v841_v39 = vld [vmem:[%s1089_s3] sm:$0xff]  ;;  %v550_v40 = vadd.f32 %v884_v38, %v544_v36 }
  0xd4   : > { %v885_v46 = vld [vmem:[%s1090_s4] ss:$0 sm:$0xff] }
  0xd5   : > { %v552_v42 = vmax.f32 %v550_v40, 0.0  ;;  %v594_v52 = vld [vmem:[%s1091_s5] sm:$0x1] }
  0xd6   : > { %585 = vmatpush.bf16.msra.mxu0 %v841_v39 }
  0xd7   : > { %v545_v37 = vld [vmem:[#allocation2 + $0x8] sm:$0xff] }
  0xd8   : > { %v551_v41 = vadd.f32 %v884_v38, %v545_v37 }
  0xda   : > { %v553_v43 = vmax.f32 %v551_v41, 0.0 }
  0xdc   : > { %v554_v44 = vpack.c.bf16 %v553_v43, %v552_v42 }
  0xde   : > { %814 = vmatmul.msk.bf16.vlgmr.msra.gmra.mxu0 %vm537_vm1, %v554_v44 }
 0x15b   : > { %v587_v45 = vpop.f32.mrf.mxu0 }
 0x15c   : > { %v588_v49 = vadd.f32 %v885_v46, %v587_v45 }
 0x15e   : > { %v592_v51 = vmax.f32 %v588_v49, 0.0 }
 0x163   : > { %v589_v47 = vpop.f32.mrf.mxu0 }
 0x164   : > { %v590_v48 = vadd.f32 %v885_v46, %v589_v47 }
 0x166   : > { %v593_v50 = vmax.f32 %v590_v48, 0.0 }
 0x168   : > { %815 = vmatpush.xpose.msk.msra.mxu1 %vm597_vm2, %v593_v50 }
 0x16c   : > { %816 = vmatpush.xpose.msk.msra.mxu1 %vm597_vm2, %v592_v51 }
 0x16f   : > { %817 = vmatmul.msk.f32.vlgmr.msra.gmra.mxu1 %vm597_vm2, %v594_v52 }
 0x1ec   : > { %v624_v54 = vpop.f32.mrf.mxu1 }
 0x1ed   : > { %v625_v55 = vadd.f32 %v624_v54, %v596_v53 }
 0x1ef   : > { %v818_v56 = vmul.f32 -1.442695, %v625_v55 }
 0x1f1   : > { %886 = vpow2.f32 %v818_v56 }
 0x1f7   : > { %v887_v57 = vpop.eup %886 }
 0x1f8   : > { %v630_v58 = vadd.f32 1.0, %v887_v57 }
 0x1fa   : > { %888 = vrcp.f32 %v630_v58  ;;  %v642_v62 = vand.u32 2147483648, %v630_v58  ;;  %v640_v0 = vand.u32 2147483647, %v630_v58  ;;  %vm636_vm4 = vweird.f32 %v630_v58 }
 0x1fc   : > { %v643_v2 = vor.u32 1.1754944e-38, %v642_v62  ;;  %vm641_vm7 = vcmp.eq.f32.partialorder %v640_v0, 8.507059e+37 }
 0x200   : > { %v889_v59 = vpop.eup %888 }
 0x201   : > { %v632_v60 = vmul.f32 %v889_v59, %v630_v58  ;;  %vm637_vm3 = vweird.f32 %v889_v59 }
 0x202   : > { %vm638_vm5 = vmor %vm636_vm4, %vm637_vm3 }
 0x203   : > { %v633_v61 = vsub.f32 1.0, %v632_v60 }
 0x205   : > { %v634_v63 = vmul.f32 %v889_v59, %v633_v61 }
 0x207   : > { %v635_v1 = vadd.f32 %v889_v59, %v634_v63 }
 0x209   : > { %v639_v3 = vsel %vm638_vm5, %v889_v59, %v635_v1 }
 0x20a   : > { %v644_v4 = vsel %vm641_vm7, %v643_v2, %v639_v3 }
 0x20b   : > { %647 = vst.msk [vmem:[%s1093_s7] sm:$0x1] %vm646_vm6, %v644_v4 }
 0x20c PF: > { %s18_s30 = sadd.s32 1, %s928_s30   ;;  %s1094_s26 = smov %s916_s27 }
 0x20d   : > { %p15_p12 = scmp.ge.s32.totalorder %s18_s30, 6   ;;  %s1095_s27 = smov %s1009_s10 }
 0x20e   : > { %s1096_s28 = smov %s924_s29  ;;  %s1097_s29 = smov %s1099_s6 }
 0x20f   :  { %17 = sbr.rel (!%p15_p12) target bundleno = 5 (0x5), region = 132 }

</bundles_post_ra>
